<compile_context>
chip_gen: v5e
topology: v5e:2x2
jax: 0.10.0
libtpu: 0.0.40
codegen_flags: <defaults>
</compile_context>

<pallas_src>
import jax
import jax.numpy as jnp
from jax import lax
from jax.experimental import pallas as pl
from jax.experimental.pallas import tpu as pltpu

_ROW_ALIGN = 8   # sublane alignment for the row tile


def _dummy_model_kernel(ids_ref, table_ref, out_ref):
    """out = onehot(ids) @ T, with T = E @ W^T + b fused at trace time.

    ids_ref   : (TN, 1)  int32   token ids for this row tile
    table_ref : (V, H)   float32 fused table, resident across the grid
    out_ref   : (TN, H)  float32 output tile (H = true hidden size, unpadded)
    """
    ids = ids_ref[...]                                    # (TN, 1)
    tn = ids.shape[0]
    v = table_ref.shape[0]

    # One-hot gather expressed as an MXU matmul (no dynamic gather in-kernel).
    vocab_iota = lax.broadcasted_iota(jnp.int32, (tn, v), dimension=1)
    onehot = (vocab_iota == ids).astype(jnp.float32)      # (TN, V)
    out_ref[...] = jnp.dot(onehot, table_ref[...],
                           preferred_element_type=jnp.float32)


def dummy_model_forward(ids, emb_table, weight, bias, *,
                        tile_rows=2048, min_pallas_rows=1024):
    """ids: int (B, S); emb_table: (V, H); weight: (H, H); bias: (H,)."""
    B, S = ids.shape
    V, H = emb_table.shape
    N = B * S

    emb_table = jnp.asarray(emb_table, jnp.float32)
    weight = jnp.asarray(weight, jnp.float32)
    bias = jnp.asarray(bias, jnp.float32)

    # Fuse embedding + linear + bias into one (V, H) table at trace time.
    # Valid because every one-hot row sums to exactly 1, so
    # onehot @ (E @ W^T + b) == (onehot @ E) @ W^T + b.  (~V*H*H flops, once.)
    table = emb_table @ weight.T + bias[None, :]

    if N < min_pallas_rows:
        # Tiny batches: pallas_call dispatch would dominate; fused-table gather
        # in plain XLA is already near-optimal here.
        return jnp.take(table, ids.reshape(-1), axis=0).reshape(B, S, H)

    # ---------------- Pallas path ----------------
    # Row tile: multiple of 8, capped by tile_rows, and additionally capped at
    # ~ceil(N/2) so the parallel grid axis has >= 2 tiles (both v7x TCs busy).
    tile_cap = max(_ROW_ALIGN, (tile_rows // _ROW_ALIGN) * _ROW_ALIGN)
    two_tile_cap = pl.cdiv(pl.cdiv(N, 2), _ROW_ALIGN) * _ROW_ALIGN
    tn = max(_ROW_ALIGN, min(tile_cap, two_tile_cap))
    n_tiles = pl.cdiv(N, tn)
    n_pad = n_tiles * tn

    ids_flat = ids.reshape(-1).astype(jnp.int32)
    if n_pad != N:
        # Ragged tail: pad ids with 0 (tail rows compute table[0] and are
        # sliced off below).  Skipped entirely when tn divides N.
        ids_flat = jnp.pad(ids_flat, (0, n_pad - N))
    ids_col = ids_flat.reshape(n_pad, 1)

    out = pl.pallas_call(
        _dummy_model_kernel,
        out_shape=jax.ShapeDtypeStruct((n_pad, H), jnp.float32),
        grid=(n_tiles,),
        in_specs=[
            pl.BlockSpec((tn, 1), lambda i: (i, 0)),   # ids: per-tile rows
            pl.BlockSpec((V, H), lambda i: (0, 0)),    # fused table: resident
        ],
        out_specs=pl.BlockSpec((tn, H), lambda i: (i, 0)),
        compiler_params=pltpu.CompilerParams(
            dimension_semantics=("parallel",),         # shard rows across TCs
        ),
    )(ids_col, table)

    if n_pad != N:
        out = out[:N]
    return out.reshape(B, S, H)


if __name__ == "__main__":
    VOCAB, HIDDEN = 10, 4
    BATCH, SEQ = 2, 8

    key = jax.random.PRNGKey(0)
    k_ids, k_emb, k_w, k_b = jax.random.split(key, 4)

    # Deterministic params (shapes match nn.Embedding(10,4) / nn.Linear(4,4)).
    emb_table = jax.random.normal(k_emb, (VOCAB, HIDDEN), dtype=jnp.float32)
    weight = jax.random.normal(k_w, (HIDDEN, HIDDEN), dtype=jnp.float32) * 0.5
    bias = jax.random.normal(k_b, (HIDDEN,), dtype=jnp.float32) * 0.1

    ids = jax.random.randint(k_ids, (BATCH, SEQ), 0, VOCAB, dtype=jnp.int32)

    # min_pallas_rows=0 forces the Pallas path so the kernel is exercised even
    # at this tiny size; production callers keep the default (1024).
    out = dummy_model_forward(ids, emb_table, weight, bias, min_pallas_rows=0)
    out = jax.block_until_ready(out)

    # Pure-JAX reference check (unfused math).
    ref = jnp.take(emb_table, ids, axis=0) @ weight.T + bias
    assert out.shape == (BATCH, SEQ, HIDDEN)
    assert jnp.allclose(out, ref, atol=1e-5, rtol=1e-5), float(
        jnp.max(jnp.abs(out - ref)))

    print("KERNEL_OK")
</pallas_src>

<mosaic_0001>
module attributes {stable_mosaic.version = 11 : i64} {
  func.func @_dummy_model_kernel(%arg0: i32, %arg1: memref<8x1xi32, #tpu.memory_space<vmem>>, %arg2: memref<10x4xf32, #tpu.memory_space<vmem>>, %arg3: memref<8x4xf32, #tpu.memory_space<vmem>>) attributes {dimension_semantics = [#tpu.dimension_semantics<parallel>], iteration_bounds = array<i64: 2>, scalar_prefetch = 0 : i64, scratch_operands = 0 : i64, tpu.core_type = #tpu.core_type<tc>, window_params = [{transform_indices = @transform_0, window_bounds = array<i64: 8, 1>}, {pipeline_mode = #tpu.pipeline_mode<synchronous>, transform_indices = @transform_1, window_bounds = array<i64: 10, 4>}, {transform_indices = @transform_2, window_bounds = array<i64: 8, 4>}]} {
    %c0 = arith.constant 0 : index
    %c0_0 = arith.constant 0 : index
    %0 = vector.load %arg1[%c0, %c0_0] : memref<8x1xi32, #tpu.memory_space<vmem>>, vector<8x1xi32>
    %1 = tpu.iota {dimensions = array<i32: 1>} : vector<8x10xi32>
    %2 = vector.broadcast %0 : vector<8x1xi32> to vector<8x10xi32>
    %3 = arith.cmpi eq, %1, %2 : vector<8x10xi32>
    %4 = arith.extui %3 : vector<8x10xi1> to vector<8x10xi32>
    %5 = arith.sitofp %4 : vector<8x10xi32> to vector<8x10xf32>
    %c0_1 = arith.constant 0 : index
    %c0_2 = arith.constant 0 : index
    %6 = vector.load %arg2[%c0_1, %c0_2] : memref<10x4xf32, #tpu.memory_space<vmem>>, vector<10x4xf32>
    %cst = arith.constant dense<0.000000e+00> : vector<8x4xf32>
    %7 = tpu.matmul %5, %6, %cst {dimension_numbers = #tpu.dot_dimension_numbers<[1], [0], [0], [1], [0, 0, 1, 1], [], []>} : vector<8x10xf32>, vector<10x4xf32>, vector<8x4xf32> -> vector<8x4xf32>
    %c0_3 = arith.constant 0 : index
    %c0_4 = arith.constant 0 : index
    %8 = vector.load %arg3[%c0_3, %c0_4] : memref<8x4xf32, #tpu.memory_space<vmem>>, vector<8x4xf32>
    tpu.vector_store %arg3[%c0_3, %c0_4], %7 {strides = array<i32>} : memref<8x4xf32, #tpu.memory_space<vmem>>, vector<8x4xf32>,
    return
  }
  func.func @transform_0(%arg0: i32) -> (i32, i32) {
    %c0_i32 = arith.constant 0 : i32
    %c0_i32_0 = arith.constant 0 : i32
    return %arg0, %c0_i32 : i32, i32
  }
  func.func @transform_1(%arg0: i32) -> (i32, i32) {
    %c0_i32 = arith.constant 0 : i32
    %c0_i32_0 = arith.constant 0 : i32
    %c0_i32_1 = arith.constant 0 : i32
    return %c0_i32, %c0_i32_0 : i32, i32
  }
  func.func @transform_2(%arg0: i32) -> (i32, i32) {
    %c0_i32 = arith.constant 0 : i32
    %c0_i32_0 = arith.constant 0 : i32
    return %arg0, %c0_i32 : i32, i32
  }
}

</mosaic_0001>

<bundles_post_ra>
// kernel: tpu_custom_call.1
= control target key start
LH: loop header
LB: loop body
LE: loop exit
PB: predicated region body
PF: predicated region fallthrough
CT: control target
= control target key end

     0   :  { %s281_s9 = smov 0   ;;  %s304_s0 = inlined_call_operand.vmem [shape: s32[16,1], index: 0, kind: input, shape index: {}]   ;;  %s305_s1 = inlined_call_operand.vmem [shape: f32[10,4], index: 1, kind: input, shape index: {}]   ;;  %s306_s2 = inlined_call_operand.vmem [shape: f32[16,4], index: 2, kind: output, shape index: {}]  }
   0x1 LB: > { %s233_s10 = sadd.s32 4294967295, %s262_s9   ;;  %p237_p0 = scmp.ge.s32.totalorder %s262_s9, 1  ;;  %s262_s9 = sphi %s281_s9, %s12_s9  }
   0x2   : > { %p111_p1 = scmp.lt.s32.totalorder %s262_s9, 3 }
   0x4   : > { %p112_p2 = pnand %p237_p0, %p111_p1 }
   0x5   : > { %p131_p3 = scmp.lt.s32.totalorder (!%p112_p2), %s233_s10, 1 }
   0x6   : > { %115 = sbr.rel (%p112_p2) target bundleno = 259 (0x103), region = 28 }
   0xb   : > { %v149_v0 = vld [vmem:[%s305_s1 + $0x8] sm:$0x3]  ;;  %vm154_vm0 = vcmask 1041408   ;;  %v264_v1 = vmov 0   ;;  %s308_s10 = smov (!%p131_p3, %s233_s10), 1  ;;  %v148_v3 = vld [vmem:[%s305_s1] sm:$0xff]  ;;  %v140_v4 = vlaneseq }
   0xc   : > { %255 = vset.pattern.permute.xlu0 %v264_v1  ;;  %241 = vmatpush.msk.msra.mxu0 %vm154_vm0, %v149_v0  ;;  %s238_s13 = sshll.u32 %s308_s10, 3  ;;  %vm150_vm1 = vcmask 80896   ;;  %v265_v7 = vmov 0.0   ;;  %vm178_vm3 = vcmask 31744  }
   0xd   : > { %s134_s16 = scalar_lea.vmem %s304_s0, %s238_s13  ;;  %v141_v5 = vand.u32 127, %v140_v4  ;;  %s138_s21 = scalar_lea.vmem %s306_s2, %s238_s13 }
   0xe   : > { %v139_v2 = vld [vmem:[%s134_s16] sm:$0xff]  ;;  %173 = vmatpush.msra.mxu0 %v148_v3 }
   0xf   : > { %143 = vperm.xlu0 %255, %v139_v2  }
  0x81   : > { %v144_v6 = vpop.permute.xlu0 %143 }
  0x82   : > { %vm145_vm2 = vcmp.eq.s32.totalorder %v141_v5, %v144_v6 }
  0x83   : > { %v240_v8 = vsel %vm145_vm2, 1.0, %v265_v7 }
  0x84   : > { %242 = vmatmul.msk.f32.vlgmr.msra.gmra.mxu0 %vm150_vm1, %v240_v8 }
 0x101   : > { %v175_v9 = vpop.f32.mrf.mxu0 }
 0x102   : > { %179 = vst.msk [vmem:[%s138_s21] sm:$0xff] %vm178_vm3, %v175_v9 }
 0x103 PF: > { %s12_s9 = sadd.s32 1, %s262_s9  }
 0x104   : > { %p9_p4 = scmp.ge.s32.totalorder %s12_s9, 4  }
 0x106   :  { %11 = sbr.rel (!%p9_p4) target bundleno = 1 (0x1), region = 58 }

</bundles_post_ra>
